<compile_context>
chip_gen: v6e
topology: v6e:2x2x1
jax: 0.10.0
libtpu: 0.0.40
codegen_flags: <defaults>
</compile_context>

<pallas_src>
import functools

import jax
import jax.numpy as jnp
from jax.experimental import pallas as pl
from jax.experimental.pallas import tpu as pltpu


# ----------------------------------------------------------------------------- kernels


def _sineplus_single_k(x_ref, w_ref, *rest, omega_0, has_bias):
    """Whole K fits one tile: no reduction axis, no accumulator scratch.

    x_ref: [tm, tk]   (compute dtype, e.g. bf16)
    w_ref: [tn, tk]   native torch.nn.Linear layout (W, not W.T)
    b_ref: [1,  tn]   f32 bias tile (only if has_bias)
    o_ref: [tm, tn]
    """
    if has_bias:
        b_ref, o_ref = rest
    else:
        (o_ref,) = rest

    y = jax.lax.dot_general(
        x_ref[...], w_ref[...],
        dimension_numbers=(((1,), (1,)), ((), ())),   # contract x's K with W's K
        preferred_element_type=jnp.float32)
    if has_bias:
        y = y + b_ref[...]
    o_ref[...] = (y + jnp.sin(omega_0 * y)).astype(o_ref.dtype)


def _sineplus_multi_k(x_ref, w_ref, *rest, omega_0, has_bias):
    """K tiled: reduction grid axis (last) with a resident f32 VMEM accumulator."""
    if has_bias:
        b_ref, o_ref, acc_ref = rest
    else:
        o_ref, acc_ref = rest

    k = pl.program_id(2)
    part = jax.lax.dot_general(
        x_ref[...], w_ref[...],
        dimension_numbers=(((1,), (1,)), ((), ())),
        preferred_element_type=jnp.float32)

    @pl.when(k == 0)
    def _assign():                       # assign (not zero-init + add): saves a VMEM RMW
        acc_ref[...] = part

    @pl.when(k != 0)
    def _accumulate():
        acc_ref[...] += part

    @pl.when(k == pl.num_programs(2) - 1)
    def _finalize():
        y = acc_ref[...]
        if has_bias:
            y = y + b_ref[...]
        o_ref[...] = (y + jnp.sin(omega_0 * y)).astype(o_ref.dtype)


# ----------------------------------------------------------------------------- wrapper


def sineplus_layer(x, weight, bias=None, *, omega_0=30.0,
                   compute_dtype=jnp.bfloat16, out_dtype=None,
                   tm=None, tn=None, tk=None):
    """Pallas equivalent of SineplusLayer.forward.

    Args:
      x:      [M, K] input.
      weight: [N, K] (torch.nn.Linear layout; NOT transposed).
      bias:   [N] or None.
      compute_dtype: MXU operand dtype (bf16 default; accumulation/activation stay f32).
    Returns:
      [M, N] = y + sin(omega_0 * y) with y = x @ W.T (+ b).
    """
    M, K = x.shape
    N, Kw = weight.shape
    assert K == Kw, "weight must be [output_dim, input_dim]"
    has_bias = bias is not None
    out_dtype = out_dtype or x.dtype

    # ---- K (contraction) tile: prefer a single K step (whole W row stays resident).
    if tk is None:
        if K <= 1024:
            tk = K
        else:
            tk = next((c for c in (512, 256, 128) if K % c == 0), 512)
    if K % tk != 0:
        # Zero-pad the contracted dim (zeros contribute nothing to the dot).  Rare case.
        Kp = pl.cdiv(K, tk) * tk
        x = jnp.pad(x, ((0, 0), (0, Kp - K)))
        weight = jnp.pad(weight, ((0, 0), (0, Kp - K)))
        K = Kp
    nk = K // tk

    # ---- N (output features) tile: keep whole-N resident when small.
    if tn is None:
        if N <= 512:
            tn = N
        else:
            tn = next((c for c in (512, 256, 128) if N % c == 0), N)
    nn = pl.cdiv(N, tn)

    # ---- M (batch / coordinates) tile: large for long MXU bursts; ragged last block OK.
    if tm is None:
        tm = M if M <= 512 else 512
    nm = pl.cdiv(M, tm)

    # MXU operands in compute_dtype; f32 accumulation + f32 bias/sin inside the kernel.
    x_c = x.astype(compute_dtype)
    w_c = weight.astype(compute_dtype)
    args = [x_c, w_c]
    if has_bias:
        args.append(bias.astype(jnp.float32).reshape(1, N))

    out_shape = jax.ShapeDtypeStruct((M, N), out_dtype)

    if nk == 1:
        kernel = functools.partial(_sineplus_single_k,
                                   omega_0=float(omega_0), has_bias=has_bias)
        in_specs = [
            pl.BlockSpec((tm, tk), lambda i, j: (i, 0)),
            pl.BlockSpec((tn, tk), lambda i, j: (j, 0)),
        ]
        if has_bias:
            in_specs.append(pl.BlockSpec((1, tn), lambda i, j: (0, j)))
        grid = (nm, nn)
        out_spec = pl.BlockSpec((tm, tn), lambda i, j: (i, j))
        scratch = []
        semantics = ("parallel", "parallel")
    else:
        kernel = functools.partial(_sineplus_multi_k,
                                   omega_0=float(omega_0), has_bias=has_bias)
        in_specs = [
            pl.BlockSpec((tm, tk), lambda i, j, k: (i, k)),
            pl.BlockSpec((tn, tk), lambda i, j, k: (j, k)),
        ]
        if has_bias:
            # k-invariant block index: bias stays VMEM-resident across the reduction.
            in_specs.append(pl.BlockSpec((1, tn), lambda i, j, k: (0, j)))
        grid = (nm, nn, nk)
        out_spec = pl.BlockSpec((tm, tn), lambda i, j, k: (i, j))
        scratch = [pltpu.VMEM((tm, tn), jnp.float32)]
        semantics = ("parallel", "parallel", "arbitrary")

    return pl.pallas_call(
        kernel,
        out_shape=out_shape,
        grid_spec=pltpu.PrefetchScalarGridSpec(
            num_scalar_prefetch=0,
            grid=grid,
            in_specs=in_specs,
            out_specs=out_spec,
            scratch_shapes=scratch,
        ),
        compiler_params=pltpu.CompilerParams(dimension_semantics=semantics),
    )(*args)


# ----------------------------------------------------------------------------- reference


def sineplus_reference(x, weight, bias, omega_0=30.0, compute_dtype=jnp.float32):
    """Pure-JAX reference mirroring the PyTorch forward (optionally with bf16 operands)."""
    y = jax.lax.dot_general(
        x.astype(compute_dtype), weight.astype(compute_dtype),
        dimension_numbers=(((1,), (1,)), ((), ())),
        preferred_element_type=jnp.float32)
    if bias is not None:
        y = y + bias.astype(jnp.float32)
    return y + jnp.sin(omega_0 * y)


# ----------------------------------------------------------------------------- self-test


if __name__ == "__main__":
    key = jax.random.PRNGKey(0)
    omega_0 = 30.0
    ok = True

    # ---- Test 1: canonical small layer (first-layer init), single-K-step path -------
    batch, input_dim, output_dim = 8, 32, 64
    kx, kw, kb = jax.random.split(key, 3)
    x = jax.random.uniform(kx, (batch, input_dim), jnp.float32, -1.0, 1.0)
    bound = 1.0 / input_dim                                   # is_first_layer init
    weight = jax.random.uniform(kw, (output_dim, input_dim), jnp.float32, -bound, bound)
    b_bound = 1.0 / (input_dim ** 0.5)
    bias = jax.random.uniform(kb, (output_dim,), jnp.float32, -b_bound, b_bound)

    # (a) default bf16-MXU path vs matched-precision reference (tight).
    out_bf16 = jax.block_until_ready(sineplus_layer(x, weight, bias, omega_0=omega_0))
    ref_bf16 = sineplus_reference(x, weight, bias, omega_0, compute_dtype=jnp.bfloat16)
    ok &= out_bf16.shape == (batch, output_dim)
    ok &= bool(jnp.allclose(out_bf16, ref_bf16, atol=1e-3, rtol=1e-3))

    # (b) bf16 path vs exact f32 reference (loose sanity: omega_0=30 amplifies rounding).
    ref_f32 = sineplus_reference(x, weight, bias, omega_0)
    ok &= bool(jnp.allclose(out_bf16, ref_f32, atol=5e-2, rtol=5e-2))

    # (c) f32-operand path vs f32 reference (tolerance absorbs matmul-precision defaults).
    out_f32 = jax.block_until_ready(
        sineplus_layer(x, weight, bias, omega_0=omega_0, compute_dtype=jnp.float32))
    ok &= bool(jnp.allclose(out_f32, ref_f32, atol=2e-2, rtol=2e-2))

    # ---- Test 2: multi-K-step reduction + ragged M block + bias=None path ------------
    M2, K2, N2 = 52, 256, 128
    k1, k2 = jax.random.split(kx)
    x2 = jax.random.uniform(k1, (M2, K2), jnp.float32, -1.0, 1.0)
    bound2 = (6.0 / K2) ** 0.5 / omega_0                      # hidden-layer init
    w2 = jax.random.uniform(k2, (N2, K2), jnp.float32, -bound2, bound2)

    out2 = jax.block_until_ready(
        sineplus_layer(x2, w2, None, omega_0=omega_0, tm=16, tk=128))  # forces nk=2, ragged M
    ref2 = sineplus_reference(x2, w2, None, omega_0, compute_dtype=jnp.bfloat16)
    ok &= out2.shape == (M2, N2)
    ok &= bool(jnp.allclose(out2, ref2, atol=1e-3, rtol=1e-3))

    if ok:
        print("KERNEL_OK")
</pallas_src>

<mosaic_0001>
module attributes {stable_mosaic.version = 11 : i64} {
  func.func @_sineplus_single_k(%arg0: i32, %arg1: i32, %arg2: memref<8x32xbf16, #tpu.memory_space<vmem>>, %arg3: memref<64x32xbf16, #tpu.memory_space<vmem>>, %arg4: memref<1x64xf32, #tpu.memory_space<vmem>>, %arg5: memref<8x64xf32, #tpu.memory_space<vmem>>) attributes {dimension_semantics = [#tpu.dimension_semantics<parallel>, #tpu.dimension_semantics<parallel>], iteration_bounds = array<i64: 1, 1>, scalar_prefetch = 0 : i64, scratch_operands = 0 : i64, tpu.core_type = #tpu.core_type<tc>, window_params = [{transform_indices = @transform_0, window_bounds = array<i64: 8, 32>}, {transform_indices = @transform_1, window_bounds = array<i64: 64, 32>}, {transform_indices = @transform_2, window_bounds = array<i64: 1, 64>}, {transform_indices = @transform_3, window_bounds = array<i64: 8, 64>}]} {
    %c0 = arith.constant 0 : index
    %c0_0 = arith.constant 0 : index
    %0 = vector.load %arg2[%c0, %c0_0] : memref<8x32xbf16, #tpu.memory_space<vmem>>, vector<8x32xbf16>
    %c0_1 = arith.constant 0 : index
    %c0_2 = arith.constant 0 : index
    %1 = vector.load %arg3[%c0_1, %c0_2] : memref<64x32xbf16, #tpu.memory_space<vmem>>, vector<64x32xbf16>
    %cst = arith.constant dense<0.000000e+00> : vector<8x64xf32>
    %2 = tpu.matmul %0, %1, %cst {dimension_numbers = #tpu.dot_dimension_numbers<[1], [1], [0], [0], [0, 0, 1, 0], [], []>} : vector<8x32xbf16>, vector<64x32xbf16>, vector<8x64xf32> -> vector<8x64xf32>
    %c0_3 = arith.constant 0 : index
    %c0_4 = arith.constant 0 : index
    %3 = vector.load %arg4[%c0_3, %c0_4] : memref<1x64xf32, #tpu.memory_space<vmem>>, vector<1x64xf32>
    %4 = vector.broadcast %3 : vector<1x64xf32> to vector<8x64xf32>
    %5 = arith.addf %2, %4 : vector<8x64xf32>
    %cst_5 = arith.constant 3.000000e+01 : f32
    %6 = vector.broadcast %cst_5 : f32 to vector<8x64xf32>
    %7 = arith.mulf %6, %5 : vector<8x64xf32>
    %8 = math.sin %7 : vector<8x64xf32>
    %9 = arith.addf %5, %8 : vector<8x64xf32>
    %c0_6 = arith.constant 0 : index
    %c0_7 = arith.constant 0 : index
    %10 = vector.load %arg5[%c0_6, %c0_7] : memref<8x64xf32, #tpu.memory_space<vmem>>, vector<8x64xf32>
    tpu.vector_store %arg5[%c0_6, %c0_7], %9 {strides = array<i32>} : memref<8x64xf32, #tpu.memory_space<vmem>>, vector<8x64xf32>,
    return
  }
  func.func @transform_0(%arg0: i32, %arg1: i32) -> (i32, i32) {
    %c0_i32 = arith.constant 0 : i32
    %c0_i32_0 = arith.constant 0 : i32
    return %arg0, %c0_i32 : i32, i32
  }
  func.func @transform_1(%arg0: i32, %arg1: i32) -> (i32, i32) {
    %c0_i32 = arith.constant 0 : i32
    %c0_i32_0 = arith.constant 0 : i32
    return %arg1, %c0_i32 : i32, i32
  }
  func.func @transform_2(%arg0: i32, %arg1: i32) -> (i32, i32) {
    %c0_i32 = arith.constant 0 : i32
    %c0_i32_0 = arith.constant 0 : i32
    return %c0_i32, %arg1 : i32, i32
  }
  func.func @transform_3(%arg0: i32, %arg1: i32) -> (i32, i32) {
    %c0_i32 = arith.constant 0 : i32
    return %arg0, %arg1 : i32, i32
  }
}

</mosaic_0001>

<bundles_post_ra>
// kernel: tpu_custom_call.1
= control target key start
LH: loop header
LB: loop body
LE: loop exit
PB: predicated region body
PF: predicated region fallthrough
CT: control target
= control target key end

     0   :  { %v300_v1 = vmov 0.0   ;;  %vm52_vm0 = vcmask 261120   ;;  %vm301_vm1 = vmmov 0   ;;  %s380_s0 = inlined_call_operand.vmem [shape: bf16[8,32], index: 0, kind: input, shape index: {}]   ;;  %s381_s1 = inlined_call_operand.vmem [shape: bf16[64,32], index: 1, kind: input, shape index: {}]   ;;  %s382_s2 = inlined_call_operand.vmem [shape: f32[1,64], index: 2, kind: input, shape index: {}]   ;;  %s383_s3 = inlined_call_operand.hbm [shape: f32[8,64], index: 3, kind: output, shape index: {}]  }
   0x1   :  { %v270_v0 = vld [vmem:[%s381_s1 + $0x18] sm:$0xff]   ;;  %245 = vmatprep.subr.bf16.mxu0 %v300_v1  ;;  %v271_v3 = vld [vmem:[%s381_s1 + $0x10] sm:$0xff]   ;;  %253 = vmatprep.mubr.msk.bf16.mxu0 %vm301_vm1, %v300_v1 }
   0x2   :  { %v66_v2 = vsel %vm52_vm0, %v270_v0, 0 }
   0x3   :  { %246 = vmatpush3.bf16.xpose.msra.mxu0 %v66_v2 }
   0x4   :  { %247 = vmatprep.subr.bf16.mxu0 %v300_v1 }
   0x5   :  { %8 = vsyncpa [#allocation3], 0  ;;  %v63_v4 = vsel %vm52_vm0, %v271_v3, 0  ;;  %v272_v5 = vld [vmem:[%s381_s1 + $0x8] sm:$0xff]   ;;  %v273_v7 = vld [vmem:[%s381_s1] sm:$0xff]   ;;  %vm214_vm15 = vcmask 523264  }
   0x6   :  { %v60_v6 = vsel %vm52_vm0, %v272_v5, 0  ;;  %v57_v8 = vsel %vm52_vm0, %v273_v7, 0  ;;  %v16_v9 = vld [vmem:[%s380_s0] sm:$0xf]  ;;  %v302_v27 = vmov 683565275  }
   0x7   :  { %v230_v10 = vld [vmem:[%s382_s2] ss:$0 sm:$0xff]  ;;  %v303_v29 = vmov 2475754826   ;;  %v304_v32 = vmov 2131351028  }
   0x8   :  { %v305_v35 = vmov 2102212464   ;;  %v306_v38 = vmov 920167782   ;;  %v307_v41 = vmov 1326507024  }
   0x9   :  { %s308_s0 = smov [#allocation2]  }
   0xa   :  { %s222_s1 = sshll.u32 %s308_s0, 4  ;;  %s223_s1 = int_to_ptr.vmem [resolvable:$true] %s222_s1 }
   0xb   :  { %248 = vmatpush3.bf16.xpose.msra.mxu0 %v63_v4  ;;  %s278_s2 = scalar_lea.vmem %s223_s1, 128  ;;  %p283_p1 = scmp.lt.s32.totalorder %s223_s1, %s223_s1 }
   0xc   :  { %249 = vmatprep.subr.bf16.mxu0 %v300_v1  ;;  %p279_p0 = scmp.ne.s32.totalorder %s223_s1, %s278_s2  ;;  %p284_p2 = scmp.lt.s32.totalorder %s278_s2, %s278_s2 }
   0xe   :  { %p285_p3 = por %p284_p2, %p283_p1 }
  0x10   :  { %p286_p4 = pnand %p285_p3, %p279_p0 }
  0x13   :  { %250 = vmatpush3.bf16.xpose.msra.mxu0 %v60_v6 }
  0x14   :  { %251 = vmatprep.subr.bf16.mxu0 %v300_v1 }
  0x1b   :  { %252 = vmatpush3.bf16.xpose.msra.mxu0 %v57_v8 }
  0x22   :  { %254 = vmatmul.mubr.msk.bf16.vlgmr.msra.gmra.mxu0 %vm52_vm0, %v16_v9 }
  0xe2   :  { %v102_v11 = vpop.f32.mrf.mxu0 }
  0xe3   :  { %v352_v12 = vadd.f32 %v230_v10, %v102_v11 }
  0xe4   :  { %v255_v13 = vpop.f32.mrf.mxu0 }
  0xe5   :  { %v355_v14 = vmul.f32 30.0, %v352_v12 }
  0xe6   :  { %v105_v15 = vpop.f32.mrf.mxu0 }
  0xe7   :  { %v112_v16 = vand.u32 2139095040, %v355_v14  ;;  %v109_v21 = vand.u32 2147483647, %v355_v14  ;;  %vm111_vm9 = vcmp.lt.s32.totalorder %v355_v14, 0  ;;  %vm201_vm14 = vweird.f32 %v355_v14 }
  0xe8   :  { %v256_v17 = vpop.f32.mrf.mxu0 }
  0xe9   :  { %v113_v18 = vshrl.u32 %v112_v16, 23  ;;  %v116_v24 = vand.u32 8388607, %v109_v21  ;;  %vm110_vm10 = vcmp.le.f32.partialorder %v109_v21, 0.7853982 }
  0xeb   :  { %v236_v19 = vadd.s32 4294967169, %v113_v18  ;;  %v117_v43 = vor.u32 8388608, %v116_v24 }
  0xed   :  { %v119_v20 = vadd.s32 1, %v236_v19  ;;  %v157_v57 = vshll.u32 %v117_v43, 8 }
  0xef   :  { %vm120_vm2 = vcmp.gt.s32.totalorder %v119_v20, 0 }
  0xf0   :  { %v121_v22 = vsel %vm120_vm2, %v119_v20, 0 }
  0xf1   :  { %v123_v23 = vand.u32 31, %v121_v22  ;;  %v122_v26 = vshrl.u32 %v121_v22, 5 }
  0xf3   :  { %v124_v25 = vsub.s32 32, %v123_v23  ;;  %v126_v28 = vshll.u32 %v302_v27, %v123_v23  ;;  %v129_v30 = vshll.u32 %v303_v29, %v123_v23  ;;  %v132_v34 = vshll.u32 %v304_v32, %v123_v23 }
  0xf4   :  { %v135_v37 = vshll.u32 %v305_v35, %v123_v23  ;;  %v138_v40 = vshll.u32 %v306_v38, %v123_v23  ;;  %vm141_vm3 = vcmp.lt.s32.totalorder %v122_v26, 1  ;;  %vm144_vm4 = vcmp.lt.s32.totalorder %v122_v26, 4 }
  0xf5   :  { %v127_v31 = vshrl.u32 %v303_v29, %v124_v25  ;;  %v130_v33 = vshrl.u32 %v304_v32, %v124_v25  ;;  %v133_v36 = vshrl.u32 %v305_v35, %v124_v25  ;;  %v136_v39 = vshrl.u32 %v306_v38, %v124_v25 }
  0xf6   :  { %v139_v42 = vshrl.u32 %v307_v41, %v124_v25  ;;  %v125_v52 = vshrl.u32 %v302_v27, %v124_v25  ;;  %vm143_vm5 = vcmp.lt.s32.totalorder %v122_v26, 3  ;;  %vm142_vm6 = vcmp.lt.s32.totalorder %v122_v26, 2 }
  0xf7   :  { %v128_v44 = vor.u32 %v127_v31, %v126_v28  ;;  %v131_v45 = vor.u32 %v130_v33, %v129_v30  ;;  %v134_v46 = vor.u32 %v133_v36, %v132_v34  ;;  %v137_v47 = vor.u32 %v136_v39, %v135_v37 }
  0xf8   :  { %v140_v48 = vor.u32 %v139_v42, %v138_v40 }
  0xf9   :  { %v146_v49 = vsel %vm144_vm4, %v134_v46, 2102212464  ;;  %v149_v50 = vsel %vm141_vm3, %v128_v44, %v131_v45  ;;  %v153_v51 = vsel %vm141_vm3, %v131_v45, %v134_v46  ;;  %v150_v53 = vsel %vm144_vm4, %v137_v47, 920167782 }
  0xfa   :  { %v154_v54 = vsel %vm144_vm4, %v140_v48, 1326507024  ;;  %v151_v55 = vsel %vm143_vm5, %v134_v46, %v150_v53  ;;  %v145_v58 = vsel %vm141_vm3, %v125_v52, %v128_v44  ;;  %v147_v59 = vsel %vm143_vm5, %v131_v45, %v146_v49 }
  0xfb   :  { %v155_v56 = vsel %vm143_vm5, %v137_v47, %v154_v54  ;;  %v152_v60 = vsel %vm142_vm6, %v149_v50, %v151_v55  ;;  %v148_v2 = vsel %vm142_vm6, %v145_v58, %v147_v59 }
  0xfc   :  { %v156_v61 = vsel %vm142_vm6, %v153_v51, %v155_v56  ;;  %v364_v0 = vmul.u32.u64.low %v157_v57, %v152_v60  ;;  %v365_v1 = vmul.u32.u64.high %v157_v57, %v152_v60, %v364_v0  ;;  %v164_v4 = vmul.u32 %v157_v57, %v148_v2 }
  0xfd   :  { %v361_v62 = vmul.u32.u64.low %v157_v57, %v156_v61  ;;  %v362_v63 = vmul.u32.u64.high %v157_v57, %v156_v61, %v361_v62 }
  0xfe   :  { %v167_v3 = vadd.s32 1, %v365_v1 }
  0xff   :  { %vm166_vm7 = vc.u32 %v362_v63, %v364_v0  ;;  %v165_v18 = vadd.s32 %v364_v0, %v362_v63 }
 0x100   :  { %v168_v5 = vsel %vm166_vm7, %v167_v3, %v365_v1 }
 0x101   :  { %v169_v6 = vadd.s32 %v168_v5, %v164_v4 }
 0x103   :  { %v170_v7 = vadd.s32 536870912, %v169_v6 }
 0x105   :  { %v171_v8 = vshrl.u32 %v170_v7, 30 }
 0x107   :  { %v172_v9 = vshll.u32 %v171_v8, 30  ;;  %v195_v32 = vsub.s32 4, %v171_v8 }
 0x109   :  { %v173_v10 = vsub.s32 %v169_v6, %v172_v9  ;;  %v196_v35 = vsel %vm111_vm9, %v195_v32, %v171_v8 }
 0x10a   :  { %v198_v36 = vsel %vm110_vm10, 0, %v196_v35 }
 0x10b   :  { %v175_v11 = vsub.s32 0, %v173_v10  ;;  %v202_v37 = vadd.s32 3, %v198_v36 }
 0x10d   :  { %v237_v13 = vmin.u32 %v175_v11, %v173_v10  ;;  %v203_v38 = vand.u32 3, %v202_v37 }
 0x10f   :  { %v177_v15 = vclz %v237_v13  ;;  %vm208_vm11 = vcmp.eq.s32.totalorder %v203_v38, 2  ;;  %vm205_vm12 = vcmp.eq.s32.totalorder %v203_v38, 0  ;;  %vm204_vm13 = vcmp.lt.s32.totalorder %v203_v38, 2 }
 0x111   :  { %v238_v16 = vadd.s32 4294967294, %v177_v15 }
 0x113   :  { %vm239_vm8 = vcmp.lt.s32.totalorder %v238_v16, 0 }
 0x114   :  { %v180_v17 = vsel %vm239_vm8, 0, %v238_v16 }
 0x115   :  { %v181_v19 = vsub.s32 32, %v180_v17  ;;  %v185_v20 = vsub.s32 4294967266, %v180_v17  ;;  %v182_v22 = vshll.u32 %v173_v10, %v180_v17 }
 0x117   :  { %v183_v23 = vshrl.u32 %v165_v18, %v181_v19  ;;  %v186_v24 = vadd.s32 127, %v185_v20 }
 0x119   :  { %v184_v25 = vor.u32 %v183_v23, %v182_v22  ;;  %v187_v26 = vshll.u32 %v186_v24, 23 }
 0x11b   :  { %v188_v27 = vor.u32 4788187, %v187_v26  ;;  %v191_v29 = vcvt.s32.f32 %v184_v25 }
 0x11d   :  { %v189_v28 = vand.u32 2147483647, %v188_v27 }
 0x11f   :  { %v192_v30 = vmul.f32 %v191_v29, %v189_v28 }
 0x121   :  { %v193_v31 = vxor.u32 2147483648, %v192_v30 }
 0x123   :  { %v194_v33 = vsel %vm111_vm9, %v193_v31, %v192_v30 }
 0x124   :  { %v197_v34 = vsel %vm110_vm10, %v355_v14, %v194_v33 }
 0x125   :  { %274 = vcosq.f32 %v197_v34 }
 0x126   :  { %276 = vsinq.f32 %v197_v34 }
 0x132   :  { %v275_v39 = vpop.eup %274 }
 0x133   :  { %v277_v40 = vpop.eup %276  ;;  %v209_v41 = vxor.u32 2147483648, %v275_v39 }
 0x134   :  { %v206_v42 = vxor.u32 2147483648, %v277_v40 }
 0x135   :  { %v210_v43 = vsel %vm208_vm11, %v209_v41, %v277_v40 }
 0x136   :  { %v207_v44 = vsel %vm205_vm12, %v275_v39, %v206_v42 }
 0x137   :  { %v211_v21 = vsel %vm204_vm13, %v207_v44, %v210_v43 }
 0x138   :  { %v212_v45 = vsel %vm201_vm14, nan, %v211_v21 }
 0x139   :  { %v213_v46 = vadd.f32 %v212_v45, %v352_v12 }
 0x13b   :  { %215 = vst.msk [vmem:[#allocation2] sm:$0xff] %vm214_vm15, %v213_v46 }
 0x13c   :  { %289 = shalt.err (!%p286_p4)
}
 0x13d   :  { %225 = dma.vmem_to_hbm [thread:$0]  %s223_s1, 128, %s383_s3, [#allocation3]  }
 0x13e   :  { %298 = dma.done.wait [#allocation3], 128  }
 0x13f   :  { %299 = vsyncadd [#allocation3], 4294967168 }
 0x140   :  { %229 = vsyncpa [#allocation3], 1 }

</bundles_post_ra>
